<compile_context>
chip_gen: v7x
topology: tpu7x:2x2x1
jax: 0.10.0
libtpu: 0.0.40
codegen_flags: <defaults>
</compile_context>

<pallas_src>
import jax
import jax.numpy as jnp
from jax.experimental import pallas as pl
from jax.experimental.pallas import tpu as pltpu


def qnet_kernel(x_ref, w1_ref, b1_ref, w2_ref, b2_ref, out_ref):
    # fc1 on the MXU with f32 accumulation; bias add + ReLU on the VPU in f32.
    h = jnp.dot(x_ref[...], w1_ref[...], preferred_element_type=jnp.float32)
    h = jnp.maximum(h + b1_ref[...], 0.0)
    # fc2: cast activations to the (possibly bf16) weight dtype for the MXU,
    # accumulate in f32, add bias in f32; store in out_ref's dtype.
    o = jnp.dot(h.astype(w2_ref.dtype), w2_ref[...],
                preferred_element_type=jnp.float32)
    out_ref[...] = (o + b2_ref[...]).astype(out_ref.dtype)


def _round_up(n, m):
    return ((n + m - 1) // m) * m


def prepare_qnet_params(w1, b1, w2, b2, *, compute_dtype=None):
    """One-time parameter prep (call ONCE, not per forward step).

    * Casts matmul weights to `compute_dtype` (None keeps f32); biases stay f32.
    * Builds a lane-dense copy of fc2 (action_dim zero-padded to 128) used only
      by the batched path, so its output store is a full-width vst.
    """
    mm_dtype = jnp.float32 if compute_dtype is None else compute_dtype
    S, H = w1.shape
    A = w2.shape[1]
    A_pad = _round_up(A, 128)

    w1c = w1.astype(mm_dtype)
    w2c = w2.astype(mm_dtype)
    b1c = jnp.asarray(b1, jnp.float32).reshape(1, H)
    b2c = jnp.asarray(b2, jnp.float32).reshape(1, A)

    if A_pad != A:
        w2p = jnp.pad(w2c, ((0, 0), (0, A_pad - A)))
        b2p = jnp.pad(b2c, ((0, 0), (0, A_pad - A)))
    else:
        w2p, b2p = w2c, b2c

    return dict(w1=w1c, b1=b1c, w2=w2c, b2=b2c, w2_pad=w2p, b2_pad=b2p,
                state_dim=S, hidden_dim=H, action_dim=A, action_dim_pad=A_pad,
                compute_dtype=mm_dtype)


def _pick_batch_tiling(B, *, max_block=1024, min_steps=2):
    """Adaptive batch tile: >= `min_steps` grid steps (keeps both v7x
    TensorCores busy under the "parallel" axis) and <= `max_block` rows per
    step; rounded to the 8-row sublane so padding waste stays < 8 rows/step."""
    num_steps = max(min_steps, pl.cdiv(B, max_block))
    block_b = _round_up(pl.cdiv(B, num_steps), 8)
    return block_b, num_steps


def qnet_forward(x, params, *, small_batch_max=256, max_block=1024):
    """Q-network forward pass using prepared params (see prepare_qnet_params)."""
    B, S = x.shape
    H = params["hidden_dim"]
    A = params["action_dim"]
    A_pad = params["action_dim_pad"]
    mm_dtype = params["compute_dtype"]
    orig_dtype = x.dtype

    x = x.astype(mm_dtype)

    if B <= small_batch_max:
        # Latency path: single un-gridded call, all operands VMEM-resident,
        # action_dim left unpadded (tiny masked store; no inflated w2 DMA).
        B_pad = _round_up(B, 8)
        if B_pad != B:
            x = jnp.pad(x, ((0, B_pad - B), (0, 0)))
        out = pl.pallas_call(
            qnet_kernel,
            out_shape=jax.ShapeDtypeStruct((B_pad, A), jnp.float32),
            in_specs=[pl.BlockSpec(memory_space=pltpu.MemorySpace.VMEM)] * 5,
            out_specs=pl.BlockSpec(memory_space=pltpu.MemorySpace.VMEM),
        )(x, params["w1"], params["b1"], params["w2"], params["b2"])
        return out[:B, :].astype(orig_dtype)

    # Replay/batched path: grid over batch tiles marked "parallel" (shards
    # across the 2 TensorCores on v7x); weights/biases stay VMEM-resident
    # (index_map -> (0, 0)).  Output is lane-dense (A padded to 128) and is
    # written back in the matmul dtype (bf16 halves the dominant writeback).
    block_b, num_steps = _pick_batch_tiling(B, max_block=max_block)
    B_pad = block_b * num_steps
    if B_pad != B:
        x = jnp.pad(x, ((0, B_pad - B), (0, 0)))

    out = pl.pallas_call(
        qnet_kernel,
        out_shape=jax.ShapeDtypeStruct((B_pad, A_pad), mm_dtype),
        grid=(num_steps,),
        in_specs=[
            pl.BlockSpec((block_b, S), lambda i: (i, 0)),
            pl.BlockSpec((S, H), lambda i: (0, 0)),
            pl.BlockSpec((1, H), lambda i: (0, 0)),
            pl.BlockSpec((H, A_pad), lambda i: (0, 0)),
            pl.BlockSpec((1, A_pad), lambda i: (0, 0)),
        ],
        out_specs=pl.BlockSpec((block_b, A_pad), lambda i: (i, 0)),
        compiler_params=pltpu.CompilerParams(
            dimension_semantics=("parallel",),
        ),
    )(x, params["w1"], params["b1"], params["w2_pad"], params["b2_pad"])
    return out[:B, :A].astype(orig_dtype)


def init_qnet_params(key, state_dim, hidden_dim, action_dim):
    # Mimic torch.nn.Linear default init: U[-1/sqrt(fan_in), 1/sqrt(fan_in)].
    k1, k2, k3, k4 = jax.random.split(key, 4)
    bound1 = 1.0 / jnp.sqrt(state_dim)
    bound2 = 1.0 / jnp.sqrt(hidden_dim)
    w1 = jax.random.uniform(k1, (state_dim, hidden_dim), jnp.float32, -bound1, bound1)
    b1 = jax.random.uniform(k2, (1, hidden_dim), jnp.float32, -bound1, bound1)
    w2 = jax.random.uniform(k3, (hidden_dim, action_dim), jnp.float32, -bound2, bound2)
    b2 = jax.random.uniform(k4, (1, action_dim), jnp.float32, -bound2, bound2)
    return w1, b1, w2, b2


def _ref_forward(x, w1, b1, w2, b2):
    return jnp.maximum(x @ w1 + b1, 0.0) @ w2 + b2


if __name__ == "__main__":
    # CartPole-like DQN sizes: state_dim=4, hidden_dim=128, action_dim=2.
    state_dim, hidden_dim, action_dim = 4, 128, 2

    key = jax.random.PRNGKey(0)
    kx1, kx2, kx3, kp = jax.random.split(key, 4)
    w1, b1, w2, b2 = init_qnet_params(kp, state_dim, hidden_dim, action_dim)

    # One-time parameter prep (hoisted out of the per-step hot path).
    params_f32 = prepare_qnet_params(w1, b1, w2, b2)
    params_bf16 = prepare_qnet_params(w1, b1, w2, b2, compute_dtype=jnp.bfloat16)

    # 1) Tiny batch (action-selection path): ungridded, all-VMEM, unpadded A.
    x_small = jax.random.normal(kx1, (8, state_dim), dtype=jnp.float32)
    out_small = qnet_forward(x_small, params_f32)
    jax.block_until_ready(out_small)
    ref_small = _ref_forward(x_small, w1, b1, w2, b2)
    assert out_small.shape == (8, action_dim)
    assert jnp.allclose(out_small, ref_small, atol=1e-5, rtol=1e-5)

    # 2) Replay batch, f32: B=300 -> adaptive tiling = 2 tiles x 152 rows
    #    (both v7x cores busy, <8 padded rows per tile instead of 212).
    x_big = jax.random.normal(kx2, (300, state_dim), dtype=jnp.float32)
    out_big = qnet_forward(x_big, params_f32)
    jax.block_until_ready(out_big)
    ref_big = _ref_forward(x_big, w1, b1, w2, b2)
    assert out_big.shape == (300, action_dim)
    assert jnp.allclose(out_big, ref_big, atol=1e-5, rtol=1e-5)

    # 3) Replay batch, bf16 matmuls + bf16 lane-dense writeback: B=1024 ->
    #    2 tiles x 512 rows (fine on every generation, incl. v5e).
    x_huge = jax.random.normal(kx3, (1024, state_dim), dtype=jnp.float32)
    out_bf16 = qnet_forward(x_huge, params_bf16)
    jax.block_until_ready(out_bf16)
    ref_huge = _ref_forward(x_huge, w1, b1, w2, b2)
    assert out_bf16.shape == (1024, action_dim)
    assert jnp.allclose(out_bf16, ref_huge, atol=5e-2, rtol=5e-2)

    print("KERNEL_OK")
</pallas_src>

<mosaic_0001>
module attributes {stable_mosaic.version = 11 : i64} {
  func.func @qnet_kernel(%arg0: memref<8x4xf32, #tpu.memory_space<vmem>>, %arg1: memref<4x128xf32, #tpu.memory_space<vmem>>, %arg2: memref<1x128xf32, #tpu.memory_space<vmem>>, %arg3: memref<128x2xf32, #tpu.memory_space<vmem>>, %arg4: memref<1x2xf32, #tpu.memory_space<vmem>>, %arg5: memref<8x2xf32, #tpu.memory_space<vmem>>) attributes {dimension_semantics = [], scalar_prefetch = 0 : i64, scratch_operands = 0 : i64, tpu.core_type = #tpu.core_type<tc>} {
    %c0 = arith.constant 0 : index
    %c0_0 = arith.constant 0 : index
    %0 = vector.load %arg0[%c0, %c0_0] : memref<8x4xf32, #tpu.memory_space<vmem>>, vector<8x4xf32>
    %c0_1 = arith.constant 0 : index
    %c0_2 = arith.constant 0 : index
    %1 = vector.load %arg1[%c0_1, %c0_2] : memref<4x128xf32, #tpu.memory_space<vmem>>, vector<4x128xf32>
    %cst = arith.constant dense<0.000000e+00> : vector<8x128xf32>
    %2 = tpu.matmul %0, %1, %cst {dimension_numbers = #tpu.dot_dimension_numbers<[1], [0], [0], [1], [0, 0, 1, 1], [], []>} : vector<8x4xf32>, vector<4x128xf32>, vector<8x128xf32> -> vector<8x128xf32>
    %c0_3 = arith.constant 0 : index
    %c0_4 = arith.constant 0 : index
    %3 = vector.load %arg2[%c0_3, %c0_4] : memref<1x128xf32, #tpu.memory_space<vmem>>, vector<1x128xf32>
    %4 = vector.broadcast %3 : vector<1x128xf32> to vector<8x128xf32>
    %5 = arith.addf %2, %4 : vector<8x128xf32>
    %cst_5 = arith.constant 0.000000e+00 : f32
    %6 = vector.broadcast %cst_5 : f32 to vector<8x128xf32>
    %7 = arith.maximumf %5, %6 : vector<8x128xf32>
    %c0_6 = arith.constant 0 : index
    %c0_7 = arith.constant 0 : index
    %8 = vector.load %arg3[%c0_6, %c0_7] : memref<128x2xf32, #tpu.memory_space<vmem>>, vector<128x2xf32>
    %cst_8 = arith.constant dense<0.000000e+00> : vector<8x2xf32>
    %9 = tpu.matmul %7, %8, %cst_8 {dimension_numbers = #tpu.dot_dimension_numbers<[1], [0], [0], [1], [0, 0, 1, 1], [], []>} : vector<8x128xf32>, vector<128x2xf32>, vector<8x2xf32> -> vector<8x2xf32>
    %c0_9 = arith.constant 0 : index
    %c0_10 = arith.constant 0 : index
    %10 = vector.load %arg4[%c0_9, %c0_10] : memref<1x2xf32, #tpu.memory_space<vmem>>, vector<1x2xf32>
    %11 = vector.broadcast %10 : vector<1x2xf32> to vector<8x2xf32>
    %12 = arith.addf %9, %11 : vector<8x2xf32>
    %c0_11 = arith.constant 0 : index
    %c0_12 = arith.constant 0 : index
    %13 = vector.load %arg5[%c0_11, %c0_12] : memref<8x2xf32, #tpu.memory_space<vmem>>, vector<8x2xf32>
    tpu.vector_store %arg5[%c0_11, %c0_12], %12 {strides = array<i32>} : memref<8x2xf32, #tpu.memory_space<vmem>>, vector<8x2xf32>,
    return
  }
}

</mosaic_0001>

<bundles_post_ra>
// kernel: tpu_custom_call.1
= control target key start
LH: loop header
LB: loop body
LE: loop exit
PB: predicated region body
PF: predicated region fallthrough
CT: control target
= control target key end

     0   :  { %vm33_vm0 = vcmask 1043456   ;;  %vm29_vm1 = vcmask 31744   ;;  %v297_v0 = vmov 0.0   ;;  %vm298_vm2 = vmmov 0   ;;  %s393_s1 = inlined_call_operand.vmem [shape: f32[4,128], index: 1, kind: input, shape index: {}]   ;;  %s394_s0 = inlined_call_operand.vmem [shape: f32[8,4], index: 0, kind: input, shape index: {}]   ;;  %s395_s3 = inlined_call_operand.vmem [shape: f32[128,2], index: 3, kind: input, shape index: {}]   ;;  %s396_s2 = inlined_call_operand.vmem [shape: f32[1,128], index: 2, kind: input, shape index: {}]   ;;  %s397_s4 = inlined_call_operand.vmem [shape: f32[1,2], index: 4, kind: input, shape index: {}]   ;;  %s398_s5 = inlined_call_operand.vmem [shape: f32[8,2], index: 5, kind: output, shape index: {}]  }
   0x1   :  { %230 = vmatprep.subr.mxu0 %v297_v0  ;;  %v21_v1 = vld [vmem:[%s393_s1] sm:$0xf]  ;;  %232 = vmatprep.mubr.msk.f32.mxu0 %vm298_vm2, %v297_v0  ;;  %v299_v4 = vmov 0.0|0.0   ;;  %v109_v5 = vld [vmem:[%s395_s3 + $0x8] sm:$0xff]  ;;  %v110_v6 = vld [vmem:[%s395_s3 + $0x10] sm:$0xff]  ;;  %vm201_vm3 = vcmask 15360  }
   0x2   :  { %v20_v2 = vld [vmem:[%s394_s0] sm:$0xff]  ;;  %231 = vmatpush3.msk.msra.mxu0 %vm33_vm0, %v21_v1  ;;  %270 = vmatprep.subr.bf16.mxu1 %v299_v4  ;;  %v111_v7 = vld [vmem:[%s395_s3 + $0x18] sm:$0xff]  ;;  %v113_v11 = vld [vmem:[%s395_s3 + $0x28] sm:$0xff] }
   0x3   :  { %v108_v3 = vld [vmem:[%s395_s3] sm:$0xff]  ;;  %233 = vmatmul.mubr.msk.f32.vlgmr.msra.gmra.mrb[0].mxu0 %vm29_vm1, %v20_v2  ;;  %267 = vmatprep.mubr.msk.f32.mxu1 %vm298_vm2, %v297_v0  ;;  %v274_v9 = vpack.c.bf16 %v111_v7, %v110_v6  ;;  %v114_v13 = vld [vmem:[%s395_s3 + $0x30] sm:$0xff]  ;;  %v115_v14 = vld [vmem:[%s395_s3 + $0x38] sm:$0xff] }
   0x4   :  { %v271_v8 = vpack.c.bf16 %v109_v5, %v108_v3  ;;  %v112_v10 = vld [vmem:[%s395_s3 + $0x20] sm:$0xff]  ;;  %v280_v15 = vpack.c.bf16 %v115_v14, %v114_v13  ;;  %v117_v17 = vld [vmem:[%s395_s3 + $0x48] sm:$0xff]  ;;  %v118_v19 = vld [vmem:[%s395_s3 + $0x50] sm:$0xff] }
   0x5   :  { %v277_v12 = vpack.c.bf16 %v113_v11, %v112_v10  ;;  %v116_v16 = vld [vmem:[%s395_s3 + $0x40] sm:$0xff]  ;;  %v119_v20 = vld [vmem:[%s395_s3 + $0x58] sm:$0xff]  ;;  %v121_v23 = vld [vmem:[%s395_s3 + $0x68] sm:$0xff] }
   0x6   :  { %272 = vmatpush3.bf16.msra.mxu1 %v271_v8  ;;  %v283_v18 = vpack.c.bf16 %v117_v17, %v116_v16  ;;  %v286_v21 = vpack.c.bf16 %v119_v20, %v118_v19  ;;  %v120_v22 = vld [vmem:[%s395_s3 + $0x60] sm:$0xff]  ;;  %v122_v25 = vld [vmem:[%s395_s3 + $0x70] sm:$0xff]  ;;  %v123_v26 = vld [vmem:[%s395_s3 + $0x78] sm:$0xff] }
   0x7   :  { %273 = vmatprep.subr.bf16.mxu1 %v299_v4  ;;  %v289_v24 = vpack.c.bf16 %v121_v23, %v120_v22  ;;  %v292_v27 = vpack.c.bf16 %v123_v26, %v122_v25  ;;  %v207_v28 = vld [vmem:[%s396_s2] ss:$0 sm:$0xff] }
   0x8   :  { %v210_v33 = vld [vmem:[%s397_s4] ss:$0 sm:$0xff] }
   0xa   :  { %275 = vmatpush3.bf16.msra.mxu1 %v274_v9 }
   0xb   :  { %276 = vmatprep.subr.bf16.mxu1 %v299_v4 }
   0xe   :  { %278 = vmatpush3.bf16.msra.mxu1 %v277_v12 }
   0xf   :  { %279 = vmatprep.subr.bf16.mxu1 %v299_v4 }
  0x12   :  { %281 = vmatpush3.bf16.msra.mxu1 %v280_v15 }
  0x13   :  { %282 = vmatprep.subr.bf16.mxu1 %v299_v4 }
  0x16   :  { %284 = vmatpush3.bf16.msra.mxu1 %v283_v18 }
  0x17   :  { %285 = vmatprep.subr.bf16.mxu1 %v299_v4 }
  0x1a   :  { %287 = vmatpush3.bf16.msra.mxu1 %v286_v21 }
  0x1b   :  { %288 = vmatprep.subr.bf16.mxu1 %v299_v4 }
  0x1e   :  { %290 = vmatpush3.bf16.msra.mxu1 %v289_v24 }
  0x1f   :  { %291 = vmatprep.subr.bf16.mxu1 %v299_v4 }
  0x22   :  { %293 = vmatpush3.bf16.msra.mxu1 %v292_v27 }
  0xd6   :  { %v103_v29 = vpop.f32.mrb[0].mxu0 }
  0xd7   :  { %v104_v30 = vadd.f32 %v207_v28, %v103_v29  ;;  %v234_v31 = vpop.f32.mrb[1].mxu0 }
  0xd9   :  { %v107_v32 = vmax.f32 %v104_v30, 0.0 }
  0xdb   :  { %268 = vmatmul.mubr.f32.vlgmr.msra.gmra.mrb[0].mxu1 %v107_v32 }
 0x1ae   :  { %v197_v34 = vpop.f32.mrb[0].mxu1 }
 0x1af   :  { %v198_v35 = vadd.f32 %v210_v33, %v197_v34  ;;  %v269_v36 = vpop.f32.mrb[1].mxu1 }
 0x1b1   :  { %202 = vst.msk [vmem:[%s398_s5] sm:$0xff] %vm201_vm3, %v198_v35 }

</bundles_post_ra>
